<compile_context>
chip_gen: v6e
topology: v6e:2x2x1
jax: 0.10.0
libtpu: 0.0.40
codegen_flags: <defaults>
</compile_context>

<pallas_src>
import functools
import math

import jax
import jax.numpy as jnp
from jax.experimental import pallas as pl
from jax.experimental.pallas import tpu as pltpu


def _round_up(x, m):
    return ((x + m - 1) // m) * m


def _cdiv(a, b):
    return (a + b - 1) // b


def sine_encoding_kernel(e_ref, div_ref, wblk_ref, we_ref, b_ref, o_ref, sc_ref,
                         *, k, H, Hh):
    """One grid step: tmr packed rows -> (tmr, k*H) lane-dense output tile.

    e_ref:   (tmr, kp)  kp = 8 (k>1, zero-padded cols) or 1 (k==1)
    div_ref: (1, Hh)    exp(-arange(0, H, 2) * ln(1e4)/H)
    wblk_ref:(kH, kH)   kron(I_k, W_sc) with W_sc = sin/cos rows of W^T
    we_ref:  (kp, kH)   kron(I_k, w_e) zero-padded  |  (1, H) when k == 1
    b_ref:   (1, kH)    bias tiled k times
    o_ref:   (tmr, kH)  output tile (single full-width store)
    sc_ref:  (tmr, kH)  VMEM staging for [sin | cos] per packed column group
    """
    e = e_ref[...]
    div = div_ref[...]
    # Stage sin/cos.  Lane-offset slice stores are masked vst + rotate but ride
    # the otherwise-idle vst/XLU slots; the output is only written once below.
    for j in range(k):                            # static unroll, k <= 8
        pe = (e[:, j:j + 1] * 100.0) * div        # same rounding order as ref
        sc_ref[:, j * H: j * H + Hh] = jnp.sin(pe)
        sc_ref[:, j * H + Hh: (j + 1) * H] = jnp.cos(pe)
    # Full-width `e*w_e + b` term (no partial output stores, no o_ref RMW).
    if k == 1:
        lin = e * we_ref[...] + b_ref[...]                       # (tmr,1)*(1,H)
    else:
        lin = jnp.dot(e, we_ref[...],
                      preferred_element_type=jnp.float32) + b_ref[...]
    o_ref[...] = lin + jnp.dot(sc_ref[...], wblk_ref[...],
                               preferred_element_type=jnp.float32)


def sine_encoding(e, weight, bias, hidden_dim, *, target_out_bytes=2 << 20):
    """e: (B, N) f32. weight: (H, H+1) as in nn.Linear. bias: (H,)."""
    B, N = e.shape
    H = hidden_dim
    assert H % 2 == 0, "hidden_dim must be even"
    Hh = H // 2
    M = B * N

    # Lane-dense packing: k eigenvalues per output row when H divides 128.
    # NOTE: for H < 128 with 128 % H != 0 (e.g. H=96) we fall back to k=1 —
    # correct, but output stores become masked sub-128-lane writes.
    k = 128 // H if (H < 128 and 128 % H == 0) else 1
    kH = k * H
    kp = 8 if k > 1 else 1        # packed-e columns padded to one sublane tile

    rows = _cdiv(M, k)            # packed output rows actually needed

    # Row tile: ~target_out_bytes of output per grid step (amortises the
    # ~0.35us/step pipeline overhead); multiple of 8; split into >=2 grid steps
    # when possible so both v7x TensorCores get work.
    tmr_target = max(8, (target_out_bytes // (kH * 4)) // 8 * 8)
    if rows <= 8:
        tmr = rows                                   # single (full-dim) block
    else:
        tmr = min(tmr_target, (rows // 8) * 8)
        if tmr >= rows:                              # would be a single step
            tmr = _round_up(_cdiv(rows, 2), 8)       # -> grid >= 2 (megacore)
    grid = _cdiv(rows, tmr)

    # Constant tables / weight splits (built once, resident in VMEM).
    div = jnp.exp(jnp.arange(0, H, 2, dtype=jnp.float32)
                  * (-math.log(10000.0) / H)).reshape(1, Hh)
    w_t = weight.astype(jnp.float32).T               # (H+1, H)
    w_e = w_t[0:1, :]                                # (1, H)   -> e column
    w_sc = w_t[1:, :]                                # (H, H)   rows = [sin|cos]
    eye_k = jnp.eye(k, dtype=jnp.float32)
    w_blk = jnp.kron(eye_k, w_sc) if k > 1 else w_sc             # (kH, kH)
    if k > 1:
        w_eb = jnp.kron(eye_k, w_e)                              # (k, kH)
        w_eb = jnp.pad(w_eb, ((0, kp - k), (0, 0)))              # (kp, kH)
    else:
        w_eb = w_e                                               # (1, H)
    b_full = jnp.tile(bias.astype(jnp.float32), (k,)).reshape(1, kH)

    # Pack eigenvalues: pad flat length to rows*k (<= k-1 zeros), reshape,
    # pad the packed columns to kp so the small dot has a sublane-tile K.
    e_flat = e.reshape(M).astype(jnp.float32)
    if rows * k > M:
        e_flat = jnp.pad(e_flat, (0, rows * k - M))
    e_packed = e_flat.reshape(rows, k)
    if kp > k:
        e_packed = jnp.pad(e_packed, ((0, 0), (0, kp - k)))

    kern = functools.partial(sine_encoding_kernel, k=k, H=H, Hh=Hh)
    cost = pl.CostEstimate(
        flops=2 * rows * kH * (kH + kp),
        transcendentals=rows * kH,
        bytes_accessed=4 * (rows * (kp + kH) + kH * kH + kp * kH + kH + Hh))

    out = pl.pallas_call(
        kern,
        out_shape=jax.ShapeDtypeStruct((rows, kH), jnp.float32),
        grid_spec=pltpu.PrefetchScalarGridSpec(
            num_scalar_prefetch=0,
            grid=(grid,),
            in_specs=[
                pl.BlockSpec((tmr, kp), lambda i: (i, 0)),   # packed eigenvalues
                pl.BlockSpec((1, Hh), lambda i: (0, 0)),     # div (resident)
                pl.BlockSpec((kH, kH), lambda i: (0, 0)),    # block-diag W_sc
                pl.BlockSpec(tuple(w_eb.shape), lambda i: (0, 0)),  # e-term W
                pl.BlockSpec((1, kH), lambda i: (0, 0)),     # bias (tiled)
            ],
            out_specs=pl.BlockSpec((tmr, kH), lambda i: (i, 0)),
            scratch_shapes=[pltpu.VMEM((tmr, kH), jnp.float32)],
        ),
        compiler_params=pltpu.CompilerParams(
            dimension_semantics=("parallel",),
            vmem_limit_bytes=32 * 1024 * 1024),
        cost_estimate=cost,
    )(e_packed, div, w_blk, w_eb, b_full)

    # (rows, k*H) is row-major identical to (rows*k, H): metadata reshape.
    # The [:M] slice is a no-op whenever M % k == 0 (always true for k == 1).
    out = out.reshape(rows * k, H)
    if rows * k > M:
        out = out[:M]
    return out.reshape(B, N, H)


def sine_encoding_ref(e, weight, bias, hidden_dim):
    """Pure-JAX reference mirroring the PyTorch forward exactly."""
    H = hidden_dim
    ee = e * 100.0
    div = jnp.exp(jnp.arange(0, H, 2, dtype=jnp.float32) * (-math.log(10000.0) / H))
    pe = ee[..., None] * div
    eeig = jnp.concatenate([e[..., None], jnp.sin(pe), jnp.cos(pe)], axis=2)
    return eeig @ weight.T + bias


if __name__ == "__main__":
    B, N = 2, 8

    def run_case(key, hidden_dim):
        k_e, k_w, k_b = jax.random.split(key, 3)
        e = jax.random.normal(k_e, (B, N), dtype=jnp.float32)
        bound = 1.0 / math.sqrt(hidden_dim + 1)
        weight = jax.random.uniform(k_w, (hidden_dim, hidden_dim + 1),
                                    minval=-bound, maxval=bound, dtype=jnp.float32)
        bias = jax.random.uniform(k_b, (hidden_dim,),
                                  minval=-bound, maxval=bound, dtype=jnp.float32)
        out = jax.block_until_ready(sine_encoding(e, weight, bias, hidden_dim))
        ref = sine_encoding_ref(e, weight, bias, hidden_dim)
        assert out.shape == (B, N, hidden_dim)
        assert jnp.allclose(out, ref, atol=1e-5, rtol=1e-5), \
            f"mismatch vs reference (H={hidden_dim})"

    # H=32: exercises the lane-dense packed path (k=4, single partial block).
    run_case(jax.random.PRNGKey(0), 32)
    # H=128 (module default): k=1 path, 2 grid steps (megacore-splittable).
    run_case(jax.random.PRNGKey(1), 128)

    print("KERNEL_OK")
</pallas_src>

<mosaic_0001>
module attributes {stable_mosaic.version = 11 : i64} {
  func.func @sine_encoding_kernel(%arg0: i32, %arg1: memref<4x8xf32, #tpu.memory_space<vmem>>, %arg2: memref<1x16xf32, #tpu.memory_space<vmem>>, %arg3: memref<128x128xf32, #tpu.memory_space<vmem>>, %arg4: memref<8x128xf32, #tpu.memory_space<vmem>>, %arg5: memref<1x128xf32, #tpu.memory_space<vmem>>, %arg6: memref<4x128xf32, #tpu.memory_space<vmem>>, %arg7: memref<4x128xf32, #tpu.memory_space<vmem>>) attributes {dimension_semantics = [#tpu.dimension_semantics<parallel>], iteration_bounds = array<i64: 1>, scalar_prefetch = 0 : i64, scratch_operands = 1 : i64, tpu.core_type = #tpu.core_type<tc>, window_params = [{transform_indices = @transform_0, window_bounds = array<i64: 4, 8>}, {pipeline_mode = #tpu.pipeline_mode<synchronous>, transform_indices = @transform_1, window_bounds = array<i64: 1, 16>}, {pipeline_mode = #tpu.pipeline_mode<synchronous>, transform_indices = @transform_2, window_bounds = array<i64: 128, 128>}, {pipeline_mode = #tpu.pipeline_mode<synchronous>, transform_indices = @transform_3, window_bounds = array<i64: 8, 128>}, {pipeline_mode = #tpu.pipeline_mode<synchronous>, transform_indices = @transform_4, window_bounds = array<i64: 1, 128>}, {transform_indices = @transform_5, window_bounds = array<i64: 4, 128>}]} {
    %c0 = arith.constant 0 : index
    %c0_0 = arith.constant 0 : index
    %0 = vector.load %arg1[%c0, %c0_0] : memref<4x8xf32, #tpu.memory_space<vmem>>, vector<4x8xf32>
    %c0_1 = arith.constant 0 : index
    %c0_2 = arith.constant 0 : index
    %1 = vector.load %arg2[%c0_1, %c0_2] : memref<1x16xf32, #tpu.memory_space<vmem>>, vector<1x16xf32>
    %2 = vector.extract_strided_slice %0 {offsets = [0, 0], sizes = [4, 1], strides = [1, 1]} : vector<4x8xf32> to vector<4x1xf32>
    %cst = arith.constant 1.000000e+02 : f32
    %3 = vector.broadcast %cst : f32 to vector<4x1xf32>
    %4 = arith.mulf %2, %3 : vector<4x1xf32>
    %5 = vector.broadcast %4 : vector<4x1xf32> to vector<4x16xf32>
    %6 = vector.broadcast %1 : vector<1x16xf32> to vector<4x16xf32>
    %7 = arith.mulf %5, %6 : vector<4x16xf32>
    %8 = math.sin %7 : vector<4x16xf32>
    %c0_3 = arith.constant 0 : index
    %c0_4 = arith.constant 0 : index
    %9 = vector.load %arg7[%c0_3, %c0_4] : memref<4x128xf32, #tpu.memory_space<vmem>>, vector<4x16xf32>
    tpu.vector_store %arg7[%c0_3, %c0_4], %8 {strides = array<i32>} : memref<4x128xf32, #tpu.memory_space<vmem>>, vector<4x16xf32>,
    %10 = math.cos %7 : vector<4x16xf32>
    %c0_5 = arith.constant 0 : index
    %c16 = arith.constant 16 : index
    %11 = vector.load %arg7[%c0_5, %c16] : memref<4x128xf32, #tpu.memory_space<vmem>>, vector<4x16xf32>
    tpu.vector_store %arg7[%c0_5, %c16], %10 {strides = array<i32>} : memref<4x128xf32, #tpu.memory_space<vmem>>, vector<4x16xf32>,
    %12 = vector.extract_strided_slice %0 {offsets = [0, 1], sizes = [4, 1], strides = [1, 1]} : vector<4x8xf32> to vector<4x1xf32>
    %cst_6 = arith.constant 1.000000e+02 : f32
    %13 = vector.broadcast %cst_6 : f32 to vector<4x1xf32>
    %14 = arith.mulf %12, %13 : vector<4x1xf32>
    %15 = vector.broadcast %14 : vector<4x1xf32> to vector<4x16xf32>
    %16 = vector.broadcast %1 : vector<1x16xf32> to vector<4x16xf32>
    %17 = arith.mulf %15, %16 : vector<4x16xf32>
    %18 = math.sin %17 : vector<4x16xf32>
    %c0_7 = arith.constant 0 : index
    %c32 = arith.constant 32 : index
    %19 = vector.load %arg7[%c0_7, %c32] : memref<4x128xf32, #tpu.memory_space<vmem>>, vector<4x16xf32>
    tpu.vector_store %arg7[%c0_7, %c32], %18 {strides = array<i32>} : memref<4x128xf32, #tpu.memory_space<vmem>>, vector<4x16xf32>,
    %20 = math.cos %17 : vector<4x16xf32>
    %c0_8 = arith.constant 0 : index
    %c48 = arith.constant 48 : index
    %21 = vector.load %arg7[%c0_8, %c48] : memref<4x128xf32, #tpu.memory_space<vmem>>, vector<4x16xf32>
    tpu.vector_store %arg7[%c0_8, %c48], %20 {strides = array<i32>} : memref<4x128xf32, #tpu.memory_space<vmem>>, vector<4x16xf32>,
    %22 = vector.extract_strided_slice %0 {offsets = [0, 2], sizes = [4, 1], strides = [1, 1]} : vector<4x8xf32> to vector<4x1xf32>
    %cst_9 = arith.constant 1.000000e+02 : f32
    %23 = vector.broadcast %cst_9 : f32 to vector<4x1xf32>
    %24 = arith.mulf %22, %23 : vector<4x1xf32>
    %25 = vector.broadcast %24 : vector<4x1xf32> to vector<4x16xf32>
    %26 = vector.broadcast %1 : vector<1x16xf32> to vector<4x16xf32>
    %27 = arith.mulf %25, %26 : vector<4x16xf32>
    %28 = math.sin %27 : vector<4x16xf32>
    %c0_10 = arith.constant 0 : index
    %c64 = arith.constant 64 : index
    %29 = vector.load %arg7[%c0_10, %c64] : memref<4x128xf32, #tpu.memory_space<vmem>>, vector<4x16xf32>
    tpu.vector_store %arg7[%c0_10, %c64], %28 {strides = array<i32>} : memref<4x128xf32, #tpu.memory_space<vmem>>, vector<4x16xf32>,
    %30 = math.cos %27 : vector<4x16xf32>
    %c0_11 = arith.constant 0 : index
    %c80 = arith.constant 80 : index
    %31 = vector.load %arg7[%c0_11, %c80] : memref<4x128xf32, #tpu.memory_space<vmem>>, vector<4x16xf32>
    tpu.vector_store %arg7[%c0_11, %c80], %30 {strides = array<i32>} : memref<4x128xf32, #tpu.memory_space<vmem>>, vector<4x16xf32>,
    %32 = vector.extract_strided_slice %0 {offsets = [0, 3], sizes = [4, 1], strides = [1, 1]} : vector<4x8xf32> to vector<4x1xf32>
    %cst_12 = arith.constant 1.000000e+02 : f32
    %33 = vector.broadcast %cst_12 : f32 to vector<4x1xf32>
    %34 = arith.mulf %32, %33 : vector<4x1xf32>
    %35 = vector.broadcast %34 : vector<4x1xf32> to vector<4x16xf32>
    %36 = vector.broadcast %1 : vector<1x16xf32> to vector<4x16xf32>
    %37 = arith.mulf %35, %36 : vector<4x16xf32>
    %38 = math.sin %37 : vector<4x16xf32>
    %c0_13 = arith.constant 0 : index
    %c96 = arith.constant 96 : index
    %39 = vector.load %arg7[%c0_13, %c96] : memref<4x128xf32, #tpu.memory_space<vmem>>, vector<4x16xf32>
    tpu.vector_store %arg7[%c0_13, %c96], %38 {strides = array<i32>} : memref<4x128xf32, #tpu.memory_space<vmem>>, vector<4x16xf32>,
    %40 = math.cos %37 : vector<4x16xf32>
    %c0_14 = arith.constant 0 : index
    %c112 = arith.constant 112 : index
    %41 = vector.load %arg7[%c0_14, %c112] : memref<4x128xf32, #tpu.memory_space<vmem>>, vector<4x16xf32>
    tpu.vector_store %arg7[%c0_14, %c112], %40 {strides = array<i32>} : memref<4x128xf32, #tpu.memory_space<vmem>>, vector<4x16xf32>,
    %c0_15 = arith.constant 0 : index
    %c0_16 = arith.constant 0 : index
    %42 = vector.load %arg4[%c0_15, %c0_16] : memref<8x128xf32, #tpu.memory_space<vmem>>, vector<8x128xf32>
    %cst_17 = arith.constant dense<0.000000e+00> : vector<4x128xf32>
    %43 = tpu.matmul %0, %42, %cst_17 {dimension_numbers = #tpu.dot_dimension_numbers<[1], [0], [0], [1], [0, 0, 1, 1], [], []>} : vector<4x8xf32>, vector<8x128xf32>, vector<4x128xf32> -> vector<4x128xf32>
    %c0_18 = arith.constant 0 : index
    %c0_19 = arith.constant 0 : index
    %44 = vector.load %arg5[%c0_18, %c0_19] : memref<1x128xf32, #tpu.memory_space<vmem>>, vector<1x128xf32>
    %45 = vector.broadcast %44 : vector<1x128xf32> to vector<4x128xf32>
    %46 = arith.addf %43, %45 : vector<4x128xf32>
    %c0_20 = arith.constant 0 : index
    %c0_21 = arith.constant 0 : index
    %47 = vector.load %arg7[%c0_20, %c0_21] : memref<4x128xf32, #tpu.memory_space<vmem>>, vector<4x128xf32>
    %c0_22 = arith.constant 0 : index
    %c0_23 = arith.constant 0 : index
    %48 = vector.load %arg3[%c0_22, %c0_23] : memref<128x128xf32, #tpu.memory_space<vmem>>, vector<128x128xf32>
    %cst_24 = arith.constant dense<0.000000e+00> : vector<4x128xf32>
    %49 = tpu.matmul %47, %48, %cst_24 {dimension_numbers = #tpu.dot_dimension_numbers<[1], [0], [0], [1], [0, 0, 1, 1], [], []>} : vector<4x128xf32>, vector<128x128xf32>, vector<4x128xf32> -> vector<4x128xf32>
    %50 = arith.addf %46, %49 : vector<4x128xf32>
    %c0_25 = arith.constant 0 : index
    %c0_26 = arith.constant 0 : index
    %51 = vector.load %arg6[%c0_25, %c0_26] : memref<4x128xf32, #tpu.memory_space<vmem>>, vector<4x128xf32>
    tpu.vector_store %arg6[%c0_25, %c0_26], %50 {strides = array<i32>} : memref<4x128xf32, #tpu.memory_space<vmem>>, vector<4x128xf32>,
    return
  }
  func.func @transform_0(%arg0: i32) -> (i32, i32) {
    %c0_i32 = arith.constant 0 : i32
    %c0_i32_0 = arith.constant 0 : i32
    return %arg0, %c0_i32 : i32, i32
  }
  func.func @transform_1(%arg0: i32) -> (i32, i32) {
    %c0_i32 = arith.constant 0 : i32
    %c0_i32_0 = arith.constant 0 : i32
    %c0_i32_1 = arith.constant 0 : i32
    return %c0_i32, %c0_i32_0 : i32, i32
  }
  func.func @transform_2(%arg0: i32) -> (i32, i32) {
    %c0_i32 = arith.constant 0 : i32
    %c0_i32_0 = arith.constant 0 : i32
    %c0_i32_1 = arith.constant 0 : i32
    return %c0_i32, %c0_i32_0 : i32, i32
  }
  func.func @transform_3(%arg0: i32) -> (i32, i32) {
    %c0_i32 = arith.constant 0 : i32
    %c0_i32_0 = arith.constant 0 : i32
    %c0_i32_1 = arith.constant 0 : i32
    return %c0_i32, %c0_i32_0 : i32, i32
  }
  func.func @transform_4(%arg0: i32) -> (i32, i32) {
    %c0_i32 = arith.constant 0 : i32
    %c0_i32_0 = arith.constant 0 : i32
    %c0_i32_1 = arith.constant 0 : i32
    return %c0_i32, %c0_i32_0 : i32, i32
  }
  func.func @transform_5(%arg0: i32) -> (i32, i32) {
    %c0_i32 = arith.constant 0 : i32
    %c0_i32_0 = arith.constant 0 : i32
    return %arg0, %c0_i32 : i32, i32
  }
}

</mosaic_0001>

<bundles_post_ra>
// kernel: tpu_custom_call.1
= control target key start
LH: loop header
LB: loop body
LE: loop exit
PB: predicated region body
PF: predicated region fallthrough
CT: control target
= control target key end

     0   :  { %10 = vsyncpa [#allocation4], 0  ;;  %s1820_s0 = inlined_call_operand.hbm [shape: f32[4,8], index: 0, kind: input, shape index: {}]   ;;  %s1821_s1 = inlined_call_operand.vmem [shape: f32[1,16], index: 1, kind: input, shape index: {}]   ;;  %s1822_s2 = inlined_call_operand.hbm [shape: f32[128,128], index: 2, kind: input, shape index: {}]   ;;  %s1823_s3 = inlined_call_operand.hbm [shape: f32[8,128], index: 3, kind: input, shape index: {}]   ;;  %s1824_s4 = inlined_call_operand.vmem [shape: f32[1,128], index: 4, kind: input, shape index: {}]   ;;  %s1825_s5 = inlined_call_operand.hbm [shape: f32[4,128], index: 5, kind: output, shape index: {}]  }
   0x1   :  { %11 = vsyncpa [#allocation7], 0 }
   0x2   :  { %12 = vsyncpa [#allocation5], 0  ;;  %s1389_s18 = smov [#allocation6]  }
   0x3   :  { %s30_s19 = sshll.u32 %s1389_s18, 4  ;;  %s31_s19 = int_to_ptr.vmem [resolvable:$true] %s30_s19 }
   0x4   :  { %s1311_s20 = scalar_lea.vmem %s31_s19, 2048  ;;  %p1316_p1 = scmp.lt.s32.totalorder %s31_s19, %s31_s19 }
   0x5   :  { %p1312_p0 = scmp.ne.s32.totalorder %s31_s19, %s1311_s20  ;;  %p1317_p2 = scmp.lt.s32.totalorder %s1311_s20, %s1311_s20 }
   0x7   :  { %p1318_p3 = por %p1317_p2, %p1316_p1 }
   0x9   :  { %p1319_p4 = pnand %p1318_p3, %p1312_p0 }
   0xb   :  { %1322 = shalt.err (!%p1319_p4)
}
   0xc   :  { %s1390_s21 = smov 128   ;;  %s1391_s22 = smov 8  }
   0xd   :  { %36 = dma.hbm_to_vmem [thread:$0]  %s1822_s2, 2048, %s31_s19, [#allocation7], %s1390_s21, %s1390_s21, %s1391_s22  }
   0xe   :  { %s1392_s25 = smov [#allocation3]   ;;  %s1393_s27 = smov [#allocation8]  }
   0xf   :  { %s19_s26 = sshll.u32 %s1392_s25, 4  ;;  %s43_s28 = sshll.u32 %s1393_s27, 4  ;;  %s20_s26 = int_to_ptr.vmem [resolvable:$true] %s19_s26  ;;  %s44_s28 = int_to_ptr.vmem [resolvable:$true] %s43_s28 }
  0x10   :  { %s1331_s29 = scalar_lea.vmem %s20_s26, 64  ;;  %p1336_p6 = scmp.lt.s32.totalorder %s20_s26, %s20_s26 }
  0x11   :  { %p1332_p5 = scmp.ne.s32.totalorder %s20_s26, %s1331_s29  ;;  %p1337_p7 = scmp.lt.s32.totalorder %s1331_s29, %s1331_s29 }
  0x13   :  { %p1338_p8 = por %p1337_p7, %p1336_p6 }
  0x15   :  { %p1339_p9 = pnand %p1338_p8, %p1332_p5 }
  0x17   :  { %1342 = shalt.err (!%p1339_p9)
}
  0x18   :  { %22 = dma.hbm_to_vmem [thread:$0]  %s1820_s0, 64, %s20_s26, [#allocation4]  }
  0x19   :  { %s1351_s7 = scalar_lea.vmem %s44_s28, 128  ;;  %p1356_p11 = scmp.lt.s32.totalorder %s44_s28, %s44_s28 }
  0x1a   :  { %p1352_p10 = scmp.ne.s32.totalorder %s44_s28, %s1351_s7  ;;  %p1357_p12 = scmp.lt.s32.totalorder %s1351_s7, %s1351_s7 }
  0x1c   :  { %p1358_p13 = por %p1357_p12, %p1356_p11 }
  0x1e   :  { %p1359_p0 = pnand %p1358_p13, %p1352_p10 }
  0x20   :  { %1362 = shalt.err (!%p1359_p0)
}
  0x21   :  { %46 = dma.hbm_to_vmem [thread:$0]  %s1823_s3, 128, %s44_s28, [#allocation7]  }
  0x22   :  { %1383 = dma.done.wait [#allocation4], 64  }
  0x23   :  { %1384 = vsyncadd [#allocation4], 4294967232 }
  0x24   :  { %1385 = dma.done.wait [#allocation7], 2176  }
  0x25   :  { %1386 = vsyncadd [#allocation7], 4294965120  ;;  %v1394_v0 = vmov 2   ;;  %v1395_v1 = vmov 0   ;;  %v1453_v2 = vld [vmem:[#allocation3] sm:$0xf] }
  0x26   :  { %1284 = vset.pattern.permute.xlu1 %v1394_v0  ;;  %1282 = vset.pattern.permute.xlu0 %v1395_v1  ;;  %v60_v3 = vmul.f32 100.0, %v1453_v2  ;;  %v1396_v4 = vmov 3   ;;  %v1397_v5 = vmov 1   ;;  %v1147_v6 = vld [vmem:[%s1821_s1] ss:$0 sm:$0xff]  ;;  %s1405_s1 = smov 16  }
  0x27   :  { %v1398_v43 = vmov 683565275   ;;  %v1399_v45 = vmov 2475754826   ;;  %v1400_v47 = vmov 2131351028  }
  0x28   :  { %513 = vperm.xlu1 %1284, %v60_v3   ;;  %63 = vperm.xlu0 %1282, %v60_v3   ;;  %v1401_v49 = vmov 2102212464   ;;  %v1402_v51 = vmov 920167782   ;;  %v1403_v59 = vmov 1326507024  }
  0x29   :  { %s1407_s9 = smov 48   ;;  %s1408_s10 = smov 32  }
  0x2a   :  { %s1409_s11 = smov 80   ;;  %s1410_s12 = smov 64  }
  0x2b   :  { %s1411_s13 = smov 112   ;;  %s1412_s14 = smov 96  }
  0x2c   :  { %1285 = vset.pattern.permute.xlu1 %v1396_v4  ;;  %1283 = vset.pattern.permute.xlu0 %v1397_v5  ;;  %s1413_s17 = smov [#allocation9]  }
  0x2d   :  { %737 = vperm.xlu1 %1285, %v60_v3   ;;  %289 = vperm.xlu0 %1283, %v60_v3   ;;  %s1137_s18 = sshll.u32 %s1413_s17, 4  ;;  %s1138_s18 = int_to_ptr.vmem [resolvable:$true] %s1137_s18 }
  0x2e   :  { %s1363_s19 = scalar_lea.vmem %s1138_s18, 64  ;;  %p1368_p2 = scmp.lt.s32.totalorder %s1138_s18, %s1138_s18 }
  0x2f   :  { %p1364_p1 = scmp.ne.s32.totalorder %s1138_s18, %s1363_s19  ;;  %p1369_p3 = scmp.lt.s32.totalorder %s1363_s19, %s1363_s19 }
  0x31   :  { %1286 = vset.pattern.permute.xlu0 %v1396_v4  ;;  %p1370_p4 = por %p1369_p3, %p1368_p2 }
  0x33   :  { %p1371_p5 = pnand %p1370_p4, %p1364_p1 }
  0xa3   :  { %v514_v7 = vpop.permute.xlu1 %513  ;;  %v64_v8 = vpop.permute.xlu0 %63 }
  0xa4   :  { %v1459_v9 = vmul.f32 %v1147_v6, %v514_v7  ;;  %v1461_v10 = vmul.f32 %v1147_v6, %v64_v8 }
  0xa6   :  { %v517_v11 = vand.u32 2147483647, %v1459_v9  ;;  %v520_v12 = vand.u32 2139095040, %v1459_v9  ;;  %v73_v13 = vand.u32 2147483647, %v1461_v10  ;;  %v76_v14 = vand.u32 2139095040, %v1461_v10 }
  0xa8   :  { %v521_v15 = vshrl.u32 %v520_v12, 23  ;;  %v524_v16 = vand.u32 8388607, %v517_v11  ;;  %v80_v17 = vand.u32 8388607, %v73_v13  ;;  %v738_v18 = vpop.permute.xlu1 %737  ;;  %v77_v19 = vshrl.u32 %v76_v14, 23  ;;  %v290_v22 = vpop.permute.xlu0 %289 }
  0xa9   :  { %v1471_v20 = vmul.f32 %v1147_v6, %v738_v18  ;;  %v1475_v31 = vmul.f32 %v1147_v6, %v290_v22 }
  0xaa   :  { %v1164_v21 = vadd.s32 4294967169, %v521_v15  ;;  %v525_v23 = vor.u32 8388608, %v524_v16  ;;  %v1148_v24 = vadd.s32 4294967169, %v77_v19  ;;  %v81_v27 = vor.u32 8388608, %v80_v17 }
  0xab   :  { %v744_v25 = vand.u32 2139095040, %v1471_v20  ;;  %v741_v29 = vand.u32 2147483647, %v1471_v20  ;;  %v296_v41 = vand.u32 2139095040, %v1475_v31 }
  0xac   :  { %v527_v26 = vadd.s32 1, %v1164_v21  ;;  %v83_v28 = vadd.s32 1, %v1148_v24  ;;  %v1477_v33 = vshll.u32 %v525_v23, 8  ;;  %v1479_v37 = vshll.u32 %v81_v27, 8 }
  0xad   :  { %v745_v30 = vshrl.u32 %v744_v25, 23  ;;  %v1485_v40 = vand.u32 8388607, %v741_v29 }
  0xae   :  { %vm528_vm0 = vcmp.gt.s32.totalorder %v527_v26, 0  ;;  %vm84_vm1 = vcmp.gt.s32.totalorder %v83_v28, 0 }
  0xaf   :  { %v529_v32 = vsel %vm528_vm0, %v527_v26, 0  ;;  %v85_v36 = vsel %vm84_vm1, %v83_v28, 0  ;;  %v1172_v39 = vadd.s32 4294967169, %v745_v30 }
  0xb0   :  { %v530_v34 = vshrl.u32 %v529_v32, 5  ;;  %v531_v35 = vand.u32 31, %v529_v32  ;;  %v1481_v38 = vand.u32 31, %v85_v36  ;;  %v1493_v53 = vshrl.u32 %v85_v36, 5 }
  0xb1   :  { %v751_v4 = vadd.s32 1, %v1172_v39 }
  0xb2   :  { %v532_v42 = vsub.s32 32, %v531_v35  ;;  %v534_v44 = vshll.u32 %v1398_v43, %v531_v35  ;;  %v537_v46 = vshll.u32 %v1399_v45, %v531_v35  ;;  %v540_v48 = vshll.u32 %v1400_v47, %v531_v35 }
  0xb3   :  { %v543_v50 = vshll.u32 %v1401_v49, %v531_v35  ;;  %v546_v52 = vshll.u32 %v1402_v51, %v531_v35  ;;  %vm549_vm2 = vcmp.lt.s32.totalorder %v530_v34, 1  ;;  %vm551_vm3 = vcmp.lt.s32.totalorder %v530_v34, 3 }
  0xb4   :  { %v533_v54 = vshrl.u32 %v1398_v43, %v532_v42  ;;  %v535_v55 = vshrl.u32 %v1399_v45, %v532_v42  ;;  %v538_v56 = vshrl.u32 %v1400_v47, %v532_v42  ;;  %v541_v57 = vshrl.u32 %v1401_v49, %v532_v42 }
  0xb5   :  { %v544_v58 = vshrl.u32 %v1402_v51, %v532_v42  ;;  %v547_v60 = vshrl.u32 %v1403_v59, %v532_v42  ;;  %vm552_vm4 = vcmp.lt.s32.totalorder %v530_v34, 4  ;;  %v88_v0 = vsub.s32 32, %v1481_v38 }
  0xb6   :  { %v536_v61 = vor.u32 %v535_v55, %v534_v44  ;;  %v539_v62 = vor.u32 %v538_v56, %v537_v46  ;;  %v542_v63 = vor.u32 %v541_v57, %v540_v48  ;;  %vm550_vm5 = vcmp.lt.s32.totalorder %v530_v34, 2 }
  0xb7   :  { %v545_v1 = vor.u32 %v544_v58, %v543_v50  ;;  %v548_v3 = vor.u32 %v547_v60, %v546_v52  ;;  %v90_v16 = vshll.u32 %v1398_v43, %v1481_v38  ;;  %v91_v19 = vshrl.u32 %v1399_v45, %v88_v0 }
  0xb8   :  { %v553_v5 = vsel %vm549_vm2, %v533_v54, %v536_v61  ;;  %v554_v6 = vsel %vm552_vm4, %v542_v63, 2102212464  ;;  %v557_v7 = vsel %vm549_vm2, %v536_v61, %v539_v62  ;;  %v561_v8 = vsel %vm549_vm2, %v539_v62, %v542_v63 }
  0xb9   :  { %v555_v12 = vsel %vm551_vm3, %v539_v62, %v554_v6  ;;  %v558_v14 = vsel %vm552_vm4, %v545_v1, 920167782  ;;  %v562_v15 = vsel %vm552_vm4, %v548_v3, 1326507024  ;;  %v93_v21 = vshll.u32 %v1399_v45, %v1481_v38 }
  0xba   :  { %v559_v17 = vsel %vm551_vm3, %v542_v63, %v558_v14  ;;  %v563_v18 = vsel %vm551_vm3, %v545_v1, %v562_v15  ;;  %v556_v22 = vsel %vm550_vm5, %v553_v5, %v555_v12  ;;  %v94_v25 = vshrl.u32 %v1400_v47, %v88_v0 }
  0xbb   :  { %v560_v23 = vsel %vm550_vm5, %v557_v7, %v559_v17  ;;  %v564_v24 = vsel %vm550_vm5, %v561_v8, %v563_v18  ;;  %v92_v32 = vor.u32 %v91_v19, %v90_v16  ;;  %v96_v36 = vshll.u32 %v1400_v47, %v1481_v38 }
  0xbc   :  { %v1518_v26 = vmul.u32.u64.low %v1477_v33, %v564_v24  ;;  %v1519_v27 = vmul.u32.u64.high %v1477_v33, %v564_v24, %v1518_v26  ;;  %v1522_v28 = vmul.u32.u64.low %v1477_v33, %v560_v23  ;;  %v1523_v30 = vmul.u32.u64.high %v1477_v33, %v560_v23, %v1522_v28 }
  0xbd   :  { %v95_v35 = vor.u32 %v94_v25, %v93_v21  ;;  %v97_v39 = vshrl.u32 %v1401_v49, %v88_v0  ;;  %v89_v34 = vshrl.u32 %v1398_v43, %v88_v0  ;;  %v99_v42 = vshll.u32 %v1401_v49, %v1481_v38 }
  0xbe   :  { %v100_v44 = vshrl.u32 %v1402_v51, %v88_v0  ;;  %v103_v46 = vshrl.u32 %v1403_v59, %v88_v0  ;;  %v572_v48 = vmul.u32 %v1477_v33, %v556_v22  ;;  %v102_v52 = vshll.u32 %v1402_v51, %v1481_v38 }
  0xbf   :  { %v98_v50 = vor.u32 %v97_v39, %v96_v36  ;;  %vm105_vm6 = vcmp.lt.s32.totalorder %v1493_v53, 1  ;;  %vm574_vm7 = vc.u32 %v1519_v27, %v1522_v28  ;;  %v575_v54 = vadd.s32 1, %v1523_v30 }
  0xc0   :  { %v101_v55 = vor.u32 %v100_v44, %v99_v42  ;;  %vm106_vm8 = vcmp.lt.s32.totalorder %v1493_v53, 2  ;;  %v104_v56 = vor.u32 %v103_v46, %v102_v52  ;;  %vm107_vm9 = vcmp.lt.s32.totalorder %v1493_v53, 3 }
  0xc1   :  { %vm108_vm10 = vcmp.lt.s32.totalorder %v1493_v53, 4  ;;  %v113_v33 = vsel %vm105_vm6, %v92_v32, %v95_v35  ;;  %v576_v57 = vsel %vm574_vm7, %v575_v54, %v1523_v30  ;;  %v117_v60 = vsel %vm105_vm6, %v95_v35, %v98_v50 }
  0xc2   :  { %v110_v58 = vsel %vm108_vm10, %v98_v50, 2102212464  ;;  %v114_v38 = vsel %vm108_vm10, %v101_v55, 920167782  ;;  %v577_v61 = vadd.s32 %v576_v57, %v572_v48  ;;  %v109_v62 = vsel %vm105_vm6, %v89_v34, %v92_v32 }
  0xc3   :  { %v115_v63 = vsel %vm107_vm9, %v98_v50, %v114_v38  ;;  %v118_v0 = vsel %vm108_vm10, %v104_v56, 1326507024  ;;  %v111_v1 = vsel %vm107_vm9, %v95_v35, %v110_v58  ;;  %vm752_vm11 = vcmp.gt.s32.totalorder %v751_v4, 0 }
  0xc4   :  { %v116_v3 = vsel %vm106_vm8, %v113_v33, %v115_v63  ;;  %v119_v5 = vsel %vm107_vm9, %v101_v55, %v118_v0  ;;  %v578_v6 = vadd.s32 536870912, %v577_v61  ;;  %v753_v16 = vsel %vm752_vm11, %v751_v4, 0 }
  0xc5   :  { %v120_v7 = vsel %vm106_vm8, %v117_v60, %v119_v5  ;;  %v1550_v8 = vmul.u32.u64.low %v1479_v37, %v116_v3  ;;  %v1551_v12 = vmul.u32.u64.high %v1479_v37, %v116_v3, %v1550_v8  ;;  %v112_v18 = vsel %vm106_vm8, %v109_v62, %v111_v1 }
  0xc6   :  { %v1555_v14 = vmul.u32.u64.low %v1479_v37, %v120_v7  ;;  %v1556_v15 = vmul.u32.u64.high %v1479_v37, %v120_v7, %v1555_v14  ;;  %v1558_v17 = vshrl.u32 %v578_v6, 30  ;;  %v755_v19 = vand.u32 31, %v753_v16 }
  0xc7   :  { %v749_v21 = vor.u32 8388608, %v1485_v40  ;;  %v293_v22 = vand.u32 2147483647, %v1475_v31  ;;  %v297_v23 = vshrl.u32 %v296_v41, 23  ;;  %v131_v25 = vadd.s32 1, %v1551_v12 }
  0xc8   :  { %v580_v24 = vshll.u32 %v1558_v17, 30  ;;  %v756_v26 = vsub.s32 32, %v755_v19  ;;  %v758_v4 = vshll.u32 %v1398_v43, %v755_v19  ;;  %v128_v30 = vmul.u32 %v1479_v37, %v112_v18 }
  0xc9   :  { %vm130_vm12 = vc.u32 %v1556_v15, %v1550_v8  ;;  %v761_v53 = vshll.u32 %v1399_v45, %v755_v19  ;;  %v764_v40 = vshll.u32 %v1400_v47, %v755_v19  ;;  %v754_v35 = vshrl.u32 %v753_v16, 5 }
  0xca   :  { %v1574_v32 = vsub.s32 %v577_v61, %v580_v24  ;;  %v132_v41 = vsel %vm130_vm12, %v131_v25, %v1551_v12  ;;  %v759_v36 = vshrl.u32 %v1399_v45, %v756_v26  ;;  %v762_v34 = vshrl.u32 %v1400_v47, %v756_v26 }
  0xcb   :  { %v133_v39 = vadd.s32 %v132_v41, %v128_v30  ;;  %v765_v42 = vshrl.u32 %v1401_v49, %v756_v26  ;;  %v767_v37 = vshll.u32 %v1401_v49, %v755_v19  ;;  %v768_v48 = vshrl.u32 %v1402_v51, %v756_v26 }
  0xcc   :  { %v583_v44 = vsub.s32 0, %v1574_v32  ;;  %v760_v46 = vor.u32 %v759_v36, %v758_v4  ;;  %v770_v50 = vshll.u32 %v1402_v51, %v755_v19  ;;  %v763_v54 = vor.u32 %v762_v34, %v761_v53 }
  0xcd   :  { %v134_v52 = vadd.s32 536870912, %v133_v39  ;;  %v766_v55 = vor.u32 %v765_v42, %v764_v40  ;;  %v771_v56 = vshrl.u32 %v1403_v59, %v756_v26  ;;  %v757_v57 = vshrl.u32 %v1398_v43, %v756_v26 }
  0xce   :  { %v1165_v33 = vmin.u32 %v583_v44, %v1574_v32  ;;  %v769_v58 = vor.u32 %v768_v48, %v767_v37  ;;  %vm773_vm13 = vcmp.lt.s32.totalorder %v754_v35, 1  ;;  %vm775_vm14 = vcmp.lt.s32.totalorder %v754_v35, 3 }
  0xcf   :  { %v1587_v38 = vshrl.u32 %v134_v52, 30  ;;  %v772_v60 = vor.u32 %v771_v56, %v770_v50  ;;  %vm776_vm15 = vcmp.lt.s32.totalorder %v754_v35, 4  ;;  %vm774_vm0 = vcmp.lt.s32.totalorder %v754_v35, 2 }
  0xd0   :  { %v585_v61 = vclz %v1165_v33  ;;  %v778_v62 = vsel %vm776_vm15, %v766_v55, 2102212464  ;;  %v781_v63 = vsel %vm773_vm13, %v760_v46, %v763_v54  ;;  %v782_v1 = vsel %vm776_vm15, %v769_v58, 920167782 }
  0xd1   :  { %v136_v0 = vshll.u32 %v1587_v38, 30  ;;  %v785_v3 = vsel %vm773_vm13, %v763_v54, %v766_v55  ;;  %v789_v5 = vshll.u32 %v749_v21, 8  ;;  %v777_v6 = vsel %vm773_vm13, %v757_v57, %v760_v46 }
  0xd2   :  { %v783_v7 = vsel %vm775_vm14, %v766_v55, %v782_v1  ;;  %v786_v12 = vsel %vm776_vm15, %v772_v60, 1326507024  ;;  %v1156_v14 = vadd.s32 4294967169, %v297_v23  ;;  %v779_v18 = vsel %vm775_vm14, %v763_v54, %v778_v62 }
  0xd3   :  { %v137_v16 = vsub.s32 %v133_v39, %v136_v0  ;;  %v784_v19 = vsel %vm774_vm0, %v781_v63, %v783_v7  ;;  %v787_v24 = vsel %vm775_vm14, %v769_v58, %v786_v12  ;;  %v1166_v25 = vadd.s32 4294967294, %v585_v61 }
  0xd4   :  { %v788_v26 = vsel %vm774_vm0, %v785_v3, %v787_v24  ;;  %v1595_v4 = vmul.u32.u64.low %v789_v5, %v784_v19  ;;  %v1596_v30 = vmul.u32.u64.high %v789_v5, %v784_v19, %v1595_v4  ;;  %v780_v23 = vsel %vm774_vm0, %v777_v6, %v779_v18 }
  0xd5   :  { %v139_v21 = vsub.s32 0, %v137_v16  ;;  %v1599_v53 = vmul.u32.u64.low %v789_v5, %v788_v26  ;;  %v1600_v40 = vmul.u32.u64.high %v789_v5, %v788_v26, %v1599_v53  ;;  %v303_v41 = vadd.s32 1, %v1156_v14 }
  0xd6   :  { %vm1167_vm1 = vcmp.lt.s32.totalorder %v1166_v25, 0  ;;  %v799_v39 = vadd.s32 1, %v1596_v30  ;;  %v300_v34 = vand.u32 8388607, %v293_v22  ;;  %v796_v37 = vmul.u32 %v789_v5, %v780_v23 }
  0xd7   :  { %v1149_v36 = vmin.u32 %v139_v21, %v137_v16  ;;  %vm304_vm2 = vcmp.gt.s32.totalorder %v303_v41, 0  ;;  %vm798_vm3 = vc.u32 %v1600_v40, %v1595_v4  ;;  %v1609_v48 = vsel %vm1167_vm1, 0, %v1166_v25 }
  0xd8   :  { %v305_v44 = vsel %vm304_vm2, %v303_v41, 0  ;;  %v800_v46 = vsel %vm798_vm3, %v799_v39, %v1596_v30  ;;  %v301_v55 = vor.u32 8388608, %v300_v34  ;;  %v593_v33 = vsub.s32 4294967266, %v1609_v48 }
  0xd9   :  { %v141_v42 = vclz %v1149_v36  ;;  %v801_v50 = vadd.s32 %v800_v46, %v796_v37  ;;  %v307_v52 = vand.u32 31, %v305_v44  ;;  %v129_v57 = vadd.s32 %v1550_v8, %v1556_v15 }
  0xda   :  { %v306_v60 = vshrl.u32 %v305_v44, 5  ;;  %v341_v24 = vshll.u32 %v301_v55, 8  ;;  %vm75_vm5 = vcmp.lt.s32.totalorder %v1461_v10, 0  ;;  %vm1651_vm11 = vcmp.le.f32.partialorder %v73_v13, 0.7853982 }
  0xdb   :  { %v1150_v35 = vadd.s32 4294967294, %v141_v42  ;;  %v802_v54 = vadd.s32 536870912, %v801_v50  ;;  %v308_v56 = vsub.s32 32, %v307_v52  ;;  %v310_v0 = vshll.u32 %v1398_v43, %v307_v52 }
  0xdc   :  { %v313_v5 = vshll.u32 %v1399_v45, %v307_v52  ;;  %v316_v19 = vshll.u32 %v1400_v47, %v307_v52  ;;  %v319_v30 = vshll.u32 %v1401_v49, %v307_v52  ;;  %v322_v53 = vshll.u32 %v1402_v51, %v307_v52 }
  0xdd   :  { %vm1151_vm4 = vcmp.lt.s32.totalorder %v1150_v35, 0  ;;  %v1614_v63 = vshrl.u32 %v802_v54, 30  ;;  %v311_v3 = vshrl.u32 %v1399_v45, %v308_v56  ;;  %v314_v6 = vshrl.u32 %v1400_v47, %v308_v56 }
  0xde   :  { %v144_v58 = vsel %vm1151_vm4, 0, %v1150_v35  ;;  %v317_v8 = vshrl.u32 %v1401_v49, %v308_v56  ;;  %v320_v21 = vshrl.u32 %v1402_v51, %v308_v56  ;;  %v323_v23 = vshrl.u32 %v1403_v59, %v308_v56 }
  0xdf   :  { %v145_v61 = vsub.s32 32, %v144_v58  ;;  %v149_v62 = vsub.s32 4294967266, %v144_v58  ;;  %v146_v1 = vshll.u32 %v137_v16, %v144_v58  ;;  %v804_v14 = vshll.u32 %v1614_v63, 30 }
  0xe0   :  { %v312_v15 = vor.u32 %v311_v3, %v310_v0  ;;  %v315_v18 = vor.u32 %v314_v6, %v313_v5  ;;  %v318_v45 = vor.u32 %v317_v8, %v316_v19  ;;  %v309_v47 = vshrl.u32 %v1398_v43, %v308_v56 }
  0xe1   :  { %v147_v7 = vshrl.u32 %v129_v57, %v145_v61  ;;  %v150_v12 = vadd.s32 127, %v149_v62  ;;  %v1623_v16 = vsub.s32 %v801_v50, %v804_v14  ;;  %vm325_vm6 = vcmp.lt.s32.totalorder %v306_v60, 1 }
  0xe2   :  { %v321_v34 = vor.u32 %v320_v21, %v319_v30  ;;  %v324_v42 = vor.u32 %v323_v23, %v322_v53  ;;  %vm327_vm7 = vcmp.lt.s32.totalorder %v306_v60, 3  ;;  %vm328_vm8 = vcmp.lt.s32.totalorder %v306_v60, 4  ;;  %v1058_v21 = vld [vmem:[#allocation6 + $0x78] sm:$0xff] }
  0xe3   :  { %v148_v25 = vor.u32 %v147_v7, %v146_v1  ;;  %v151_v26 = vshll.u32 %v150_v12, 23  ;;  %v807_v36 = vsub.s32 0, %v1623_v16  ;;  %v333_v44 = vsel %vm325_vm6, %v312_v15, %v315_v18 }
  0xe4   :  { %v330_v46 = vsel %vm328_vm8, %v318_v45, 2102212464  ;;  %v334_v51 = vsel %vm328_vm8, %v321_v34, 920167782  ;;  %v337_v59 = vsel %vm325_vm6, %v315_v18, %v318_v45  ;;  %v338_v35 = vsel %vm328_vm8, %v324_v42, 1326507024 }
  0xe5   :  { %v152_v41 = vor.u32 4788187, %v151_v26  ;;  %v155_v39 = vcvt.s32.f32 %v148_v25  ;;  %v1173_v37 = vmin.u32 %v807_v36, %v1623_v16  ;;  %vm326_vm9 = vcmp.lt.s32.totalorder %v306_v60, 2 }
  0xe6   :  { %v335_v43 = vsel %vm327_vm7, %v318_v45, %v334_v51  ;;  %v329_v54 = vsel %vm325_vm6, %v309_v47, %v312_v15  ;;  %v339_v56 = vsel %vm327_vm7, %v321_v34, %v338_v35  ;;  %v159_v57 = vsub.s32 4, %v1587_v38  ;;  %v1056_v34 = vld [vmem:[#allocation6 + $0x68] sm:$0xff]  ;;  %v1055_v51 = vld [vmem:[#allocation6 + $0x60] sm:$0xff] }
  0xe7   :  { %v153_v49 = vand.u32 2147483647, %v152_v41  ;;  %v809_v52 = vclz %v1173_v37  ;;  %v336_v55 = vsel %vm326_vm9, %v333_v44, %v335_v43  ;;  %v331_v62 = vsel %vm327_vm7, %v315_v18, %v330_v46 }
  0xe8   :  { %v340_v0 = vsel %vm326_vm9, %v337_v59, %v339_v56  ;;  %v1643_v5 = vmul.u32.u64.low %v341_v24, %v336_v55  ;;  %v1644_v6 = vmul.u32.u64.high %v341_v24, %v336_v55, %v1643_v5  ;;  %v332_v60 = vsel %vm326_vm9, %v329_v54, %v331_v62 }
  0xe9   :  { %v156_v50 = vmul.f32 %v155_v39, %v153_v49  ;;  %v1174_v61 = vadd.s32 4294967294, %v809_v52  ;;  %v1640_v1 = vmul.u32.u64.low %v341_v24, %v340_v0  ;;  %v1641_v3 = vmul.u32.u64.high %v341_v24, %v340_v0, %v1640_v1 }
  0xea   :  { %v589_v8 = vsub.s32 32, %v1609_v48  ;;  %v594_v15 = vadd.s32 127, %v593_v33  ;;  %v160_v18 = vsel %vm75_vm5, %v159_v57, %v1587_v38  ;;  %v351_v13 = vadd.s32 1, %v1644_v6 }
  0xeb   :  { %v157_v58 = vxor.u32 2147483648, %v156_v50  ;;  %vm1175_vm10 = vcmp.lt.s32.totalorder %v1174_v61, 0  ;;  %vm350_vm12 = vc.u32 %v1641_v3, %v1643_v5  ;;  %v348_v25 = vmul.u32 %v341_v24, %v332_v60  ;;  %v1057_v24 = vld [vmem:[#allocation6 + $0x70] sm:$0xff] }
  0xec   :  { %v1664_v19 = vsel %vm1175_vm10, 0, %v1174_v61  ;;  %v573_v26 = vadd.s32 %v1522_v28, %v1519_v27  ;;  %v352_v30 = vsel %vm350_vm12, %v351_v13, %v1644_v6  ;;  %v162_v33 = vsel %vm1651_vm11, 0, %v160_v18  ;;  %v1052_v6 = vld [vmem:[#allocation6 + $0x48] sm:$0xff] }
  0xed   :  { %v158_v7 = vsel %vm75_vm5, %v157_v58, %v156_v50  ;;  %v817_v38 = vsub.s32 4294967266, %v1664_v19  ;;  %v353_v45 = vadd.s32 %v352_v30, %v348_v25  ;;  %v595_v23 = vshll.u32 %v594_v15, 23  ;;  %v1054_v50 = vld [vmem:[#allocation6 + $0x58] sm:$0xff]  ;;  %v1053_v58 = vld [vmem:[#allocation6 + $0x50] sm:$0xff] }
  0xee   :  { %v161_v14 = vsel %vm1651_vm11, %v1461_v10, %v158_v7  ;;  %v591_v53 = vshrl.u32 %v573_v26, %v589_v8  ;;  %v166_v36 = vadd.s32 3, %v162_v33  ;;  %v1404_v47 = vmov 0.0  }
  0xef   :  { %1287 = vcosq.f32 %v161_v14  ;;  %v354_v41 = vadd.s32 536870912, %v353_v45  ;;  %1206 = vmatprep.subr.mxu1 %v1404_v47  ;;  %1201 = vmatprep.subr.mxu0 %v1404_v47  ;;  %v590_v27 = vshll.u32 %v1574_v32, %v1609_v48  ;;  %v818_v28 = vadd.s32 127, %v817_v38 }
  0xf0   :  { %1289 = vsinq.f32 %v161_v14  ;;  %1207 = vmatpush3.msra.mxu1 %v1058_v21  ;;  %v596_v49 = vor.u32 4788187, %v595_v23  ;;  %v813_v37 = vsub.s32 32, %v1664_v19  ;;  %v167_v46 = vand.u32 3, %v166_v36 }
  0xf1   :  { %v1679_v39 = vshrl.u32 %v354_v41, 30  ;;  %1208 = vmatprep.subr.mxu1 %v1404_v47  ;;  %v592_v42 = vor.u32 %v591_v53, %v590_v27  ;;  %v272_v59 = vand.u32 3, %v162_v33  ;;  %v797_v32 = vadd.s32 %v1595_v4, %v1600_v40 }
  0xf2   :  { %1209 = vmatpush3.msra.mxu1 %v1057_v24  ;;  %v819_v48 = vshll.u32 %v818_v28, 23  ;;  %vm177_vm13 = vcmask 125952   ;;  %v597_v43 = vand.u32 2147483647, %v596_v49  ;;  %v814_v55 = vshll.u32 %v1623_v16, %v1664_v19 }
  0xf3   :  { %v356_v44 = vshll.u32 %v1679_v39, 30  ;;  %1210 = vmatprep.subr.mxu1 %v1404_v47  ;;  %v599_v54 = vcvt.s32.f32 %v592_v42  ;;  %vm165_vm14 = vweird.f32 %v1461_v10  ;;  %v815_v57 = vshrl.u32 %v797_v32, %v813_v37 }
  0xf4   :  { %1211 = vmatpush3.msra.mxu1 %v1056_v34  ;;  %vm169_vm15 = vcmp.eq.s32.totalorder %v167_v46, 0  ;;  %vm172_vm0 = vcmp.eq.s32.totalorder %v167_v46, 2  ;;  %vm274_vm1 = vcmp.eq.s32.totalorder %v272_v59, 0  ;;  %vm277_vm2 = vcmp.eq.s32.totalorder %v272_v59, 2 }
  0xf5   :  { %v1687_v35 = vsub.s32 %v353_v45, %v356_v44  ;;  %1212 = vmatprep.subr.mxu1 %v1404_v47  ;;  %v820_v62 = vor.u32 4788187, %v819_v48  ;;  %vm168_vm3 = vcmp.lt.s32.totalorder %v167_v46, 2  ;;  %vm273_vm4 = vcmp.lt.s32.totalorder %v272_v59, 2 }
  0xf6   :  { %1213 = vmatpush3.msra.mxu1 %v1055_v51  ;;  %v816_v60 = vor.u32 %v815_v57, %v814_v55  ;;  %v600_v18 = vmul.f32 %v599_v54, %v597_v43  ;;  %v349_v21 = vadd.s32 %v1643_v5, %v1641_v3  ;;  %vm519_vm6 = vcmp.lt.s32.totalorder %v1459_v9, 0 }
  0xf7   :  { %v359_v4 = vsub.s32 0, %v1687_v35  ;;  %1214 = vmatprep.subr.mxu1 %v1404_v47  ;;  %v821_v25 = vand.u32 2147483647, %v820_v62  ;;  %vm1713_vm7 = vcmp.le.f32.partialorder %v517_v11, 0.7853982  ;;  %vm743_vm8 = vcmp.lt.s32.totalorder %v1471_v20, 0 }
  0xf8   :  { %1215 = vmatpush3.msra.mxu1 %v1054_v50  ;;  %v823_v30 = vcvt.s32.f32 %v816_v60  ;;  %v601_v33 = vxor.u32 2147483648, %v600_v18  ;;  %v603_v51 = vsub.s32 4, %v1558_v17  ;;  %vm1726_vm9 = vcmp.le.f32.partialorder %v741_v29, 0.7853982  ;;  %v1048_v60 = vld [vmem:[#allocation6 + $0x28] sm:$0xff] }
  0xf9   :  { %v1157_v16 = vmin.u32 %v359_v4, %v1687_v35  ;;  %1216 = vmatprep.subr.mxu1 %v1404_v47  ;;  %v379_v59 = vsub.s32 4, %v1679_v39  ;;  %vm295_vm10 = vcmp.lt.s32.totalorder %v1475_v31, 0  ;;  %vm294_vm11 = vcmp.le.f32.partialorder %v293_v22, 0.7853982 }
  0xfa   :  { %1217 = vmatpush3.msra.mxu1 %v1053_v58  ;;  %v824_v45 = vmul.f32 %v823_v30, %v821_v25  ;;  %v602_v24 = vsel %vm519_vm6, %v601_v33, %v600_v18  ;;  %v604_v29 = vsel %vm519_vm6, %v603_v51, %v1558_v17  ;;  %v827_v50 = vsub.s32 4, %v1614_v63  ;;  %v1050_v58 = vld [vmem:[#allocation6 + $0x38] sm:$0xff]  ;;  %v1044_v51 = vld [vmem:[#allocation6 + $0x8] sm:$0xff] }
  0xfb   :  { %v361_v14 = vclz %v1157_v16  ;;  %1218 = vmatprep.subr.mxu1 %v1404_v47  ;;  %v605_v3 = vsel %vm1713_vm7, %v1459_v9, %v602_v24  ;;  %v606_v54 = vsel %vm1713_vm7, 0, %v604_v29  ;;  %vm385_vm12 = vweird.f32 %v1475_v31 }
  0xfc   :  { %v1288_v52 = vpop.eup %1287  ;;  %1219 = vmatpush3.msra.mxu1 %v1052_v6  ;;  %v825_v27 = vxor.u32 2147483648, %v824_v45  ;;  %1291 = vcosq.f32 %v605_v3  ;;  %v828_v22 = vsel %vm743_vm8, %v827_v50, %v1614_v63 }
  0xfd   :  { %v1290_v56 = vpop.eup %1289  ;;  %v173_v40 = vxor.u32 2147483648, %v1288_v52  ;;  %v1158_v26 = vadd.s32 4294967294, %v361_v14  ;;  %1220 = vmatprep.subr.mxu1 %v1404_v47  ;;  %1293 = vsinq.f32 %v605_v3  ;;  %v830_v57 = vsel %vm1726_vm9, 0, %v828_v22  ;;  %v1045_v3 = vld [vmem:[#allocation6 + $0x10] sm:$0xff] }
  0xfe   :  { %v170_v61 = vxor.u32 2147483648, %v1290_v56  ;;  %v826_v5 = vsel %vm743_vm8, %v825_v27, %v824_v45  ;;  %v834_v16 = vadd.s32 3, %v830_v57  ;;  %vm968_vm8 = vcmask 64512  }
  0xff   :  { %v279_v0 = vsel %vm277_vm2, %v173_v40, %v1290_v56  ;;  %v174_v1 = vsel %vm172_vm0, %v173_v40, %v1290_v56  ;;  %vm1159_vm5 = vcmp.lt.s32.totalorder %v1158_v26, 0  ;;  %v829_v32 = vsel %vm1726_vm9, %v1471_v20, %v826_v5  ;;  %v1051_v40 = vld [vmem:[#allocation6 + $0x40] sm:$0xff] }
 0x100   :  { %v276_v7 = vsel %vm274_vm1, %v1288_v52, %v170_v61  ;;  %v171_v12 = vsel %vm169_vm15, %v1288_v52, %v170_v61  ;;  %v364_v38 = vsel %vm1159_vm5, 0, %v1158_v26  ;;  %1295 = vcosq.f32 %v829_v32  ;;  %1221 = vmatpush3.msra.mxu1 %v1051_v40 }
 0x101   :  { %v280_v8 = vsel %vm273_vm4, %v276_v7, %v279_v0  ;;  %v175_v15 = vsel %vm168_vm3, %v171_v12, %v174_v1  ;;  %v365_v53 = vsub.s32 32, %v364_v38  ;;  %v369_v10 = vsub.s32 4294967266, %v364_v38  ;;  %1222 = vmatprep.subr.mxu1 %v1404_v47  ;;  %v1049_v12 = vld [vmem:[#allocation6 + $0x30] sm:$0xff] }
 0x102   :  { %v281_v19 = vsel %vm165_vm14, nan, %v280_v8  ;;  %v176_v13 = vsel %vm165_vm14, nan, %v175_v15  ;;  %v366_v23 = vshll.u32 %v1687_v35, %v364_v38  ;;  %v380_v52 = vsel %vm295_vm10, %v379_v59, %v1679_v39  ;;  %1223 = vmatpush3.msra.mxu1 %v1050_v58 }
 0x103   :  { %283 = vrot.lane.b32.xlu1 %v281_v19, %s1405_s1  ;;  %178 = vst.msk [vmem:[#allocation2] sm:$0xf] %vm177_vm13, %v176_v13  ;;  %v367_v41 = vshrl.u32 %v349_v21, %v365_v53  ;;  %v370_v36 = vadd.s32 127, %v369_v10  ;;  %1297 = vsinq.f32 %v829_v32  ;;  %v382_v55 = vsel %vm294_vm11, 0, %v380_v52  ;;  %1224 = vmatprep.subr.mxu1 %v1404_v47  ;;  %v1047_v53 = vld [vmem:[#allocation6 + $0x20] sm:$0xff]  ;;  %v1046_v10 = vld [vmem:[#allocation6 + $0x18] sm:$0xff] }
 0x104   :  { %v610_v56 = vadd.s32 3, %v606_v54  ;;  %v386_v17 = vadd.s32 3, %v382_v55  ;;  %v1750_v39 = vand.u32 3, %v606_v54  ;;  %v496_v0 = vand.u32 3, %v382_v55  ;;  %1225 = vmatpush3.msra.mxu1 %v1049_v12 }
 0x105   :  { %v368_v28 = vor.u32 %v367_v41, %v366_v23  ;;  %v371_v34 = vshll.u32 %v370_v36, 23  ;;  %v1764_v8 = vand.u32 3, %v830_v57  ;;  %v1766_v15 = vand.u32 3, %v834_v16  ;;  %1226 = vmatprep.subr.mxu1 %v1404_v47  ;;  %v960_v23 = vld [vmem:[#allocation8] sm:$0xff]  ;;  %v1180_v57 = vld [vmem:[%s1824_s4] ss:$0 sm:$0xff] }
 0x106   :  { %v1752_v62 = vand.u32 3, %v610_v56  ;;  %v387_v1 = vand.u32 3, %v386_v17  ;;  %vm721_vm13 = vcmp.lt.s32.totalorder %v1750_v39, 2  ;;  %vm722_vm14 = vcmp.eq.s32.totalorder %v1750_v39, 0  ;;  %1227 = vmatpush3.msra.mxu1 %v1048_v60  ;;  %1202 = vmatpush3.msra.mxu0 %v960_v23 }
 0x107   :  { %v372_v42 = vor.u32 4788187, %v371_v34  ;;  %v375_v44 = vcvt.s32.f32 %v368_v28  ;;  %vm725_vm15 = vcmp.eq.s32.totalorder %v1750_v39, 2  ;;  %vm497_vm2 = vcmp.lt.s32.totalorder %v496_v0, 2  ;;  %1228 = vmatprep.subr.mxu1 %v1404_v47 }
 0x108   :  { %vm613_vm0 = vcmp.eq.s32.totalorder %v1752_v62, 0  ;;  %vm616_vm1 = vcmp.eq.s32.totalorder %v1752_v62, 2  ;;  %vm498_vm3 = vcmp.eq.s32.totalorder %v496_v0, 0  ;;  %vm501_vm4 = vcmp.eq.s32.totalorder %v496_v0, 2  ;;  %1229 = vmatpush3.msra.mxu1 %v1047_v53 }
 0x109   :  { %v373_v37 = vand.u32 2147483647, %v372_v42  ;;  %v1292_v4 = vpop.eup %1291  ;;  %vm388_vm5 = vcmp.lt.s32.totalorder %v387_v1, 2  ;;  %vm389_vm6 = vcmp.eq.s32.totalorder %v387_v1, 0  ;;  %vm392_vm7 = vcmp.eq.s32.totalorder %v387_v1, 2  ;;  %1230 = vmatprep.subr.mxu1 %v1404_v47 }
 0x10a   :  { %v1294_v61 = vpop.eup %1293  ;;  %v617_v63 = vxor.u32 2147483648, %v1292_v4  ;;  %vm612_vm9 = vcmp.lt.s32.totalorder %v1752_v62, 2  ;;  %1231 = vmatpush3.msra.mxu1 %v1046_v10 }
 0x10b   :  { %v376_v46 = vmul.f32 %v375_v44, %v373_v37  ;;  %v614_v7 = vxor.u32 2147483648, %v1294_v61  ;;  %1232 = vmatprep.subr.mxu1 %v1404_v47 }
 0x10c   :  { %v727_v25 = vsel %vm725_vm15, %v617_v63, %v1294_v61  ;;  %v618_v33 = vsel %vm616_vm1, %v617_v63, %v1294_v61  ;;  %vm837_vm15 = vcmp.eq.s32.totalorder %v1766_v15, 0  ;;  %1233 = vmatpush3.msra.mxu1 %v1045_v3  ;;  %vm836_vm1 = vcmp.lt.s32.totalorder %v1766_v15, 2 }
 0x10d   :  { %v377_v48 = vxor.u32 2147483648, %v376_v46  ;;  %v1756_v6 = vpop.eup %1295  ;;  %v724_v30 = vsel %vm722_vm14, %v1292_v4, %v614_v7  ;;  %v615_v24 = vsel %vm613_vm0, %v1292_v4, %v614_v7  ;;  %vm949_vm14 = vcmp.eq.s32.totalorder %v1764_v8, 2  ;;  %1234 = vmatprep.subr.mxu1 %v1404_v47 }
 0x10e   :  { %v841_v38 = vxor.u32 2147483648, %v1756_v6  ;;  %v728_v5 = vsel %vm721_vm13, %v724_v30, %v727_v25  ;;  %vm609_vm13 = vweird.f32 %v1459_v9  ;;  %vm945_vm0 = vcmp.lt.s32.totalorder %v1764_v8, 2  ;;  %1235 = vmatpush3.msra.mxu1 %v1044_v51 }
 0x10f   :  { %v378_v35 = vsel %vm295_vm10, %v377_v48, %v376_v46  ;;  %vm946_vm10 = vcmp.eq.s32.totalorder %v1764_v8, 0  ;;  %v729_v11 = vsel %vm609_vm13, nan, %v728_v5  ;;  %1236 = vmatprep.subr.mxu1 %v1404_v47 }
 0x110   :  { %v381_v43 = vsel %vm294_vm11, %v1475_v31, %v378_v35  ;;  %v1298_v14 = vpop.eup %1297  ;;  %vm1406_vm11 = vmmov 0   ;;  %v619_v31 = vsel %vm612_vm9, %v615_v24, %v618_v33  ;;  %v1043_v35 = vld [vmem:[#allocation6] sm:$0xff]  ;;  %vm958_vm9 = vcmask 1044352  }
 0x111   :  { %1299 = vcosq.f32 %v381_v43  ;;  %v838_v27 = vxor.u32 2147483648, %v1298_v14  ;;  %1203 = vmatprep.mubr.msk.f32.mxu0 %vm1406_vm11, %v1404_v47  ;;  %v951_v37 = vsel %vm949_vm14, %v841_v38, %v1298_v14  ;;  %1238 = vmatprep.mubr.msk.f32.mxu1 %vm1406_vm11, %v1404_v47  ;;  %v620_v59 = vsel %vm609_vm13, nan, %v619_v31 }
 0x112   :  { %1301 = vsinq.f32 %v381_v43  ;;  %1204 = vmatmul.mubr.msk.f32.vlgmr.msra.gmra.mxu0 %vm968_vm8, %v1453_v2  ;;  %1237 = vmatpush3.msra.mxu1 %v1043_v35  ;;  %vm849_vm8 = vcmask 913152  }
 0x113   :  { %v948_v44 = vsel %vm946_vm10, %v1756_v6, %v838_v27  ;;  %v839_v46 = vsel %vm837_vm15, %v1756_v6, %v838_v27 }
 0x114   :  { %v952_v32 = vsel %vm945_vm0, %v948_v44, %v951_v37 }
 0x11e   :  { %v1300_v18 = vpop.eup %1299 }
 0x11f   :  { %v1302_v19 = vpop.eup %1301  ;;  %v393_v13 = vxor.u32 2147483648, %v1300_v18 }
 0x120   :  { %v390_v26 = vxor.u32 2147483648, %v1302_v19 }
 0x121   :  { %v503_v45 = vsel %vm501_vm4, %v393_v13, %v1302_v19  ;;  %v394_v21 = vsel %vm392_vm7, %v393_v13, %v1302_v19  ;;  %vm401_vm4 = vcmask 388352   ;;  %vm734_vm7 = vcmask 781952  }
 0x122   :  { %v500_v41 = vsel %vm498_vm3, %v1300_v18, %v390_v26  ;;  %v391_v36 = vsel %vm389_vm6, %v1300_v18, %v390_v26  ;;  %vm286_vm3 = vcmask 257152   ;;  %vm625_vm6 = vcmask 650752  }
 0x123   :  { %v504_v28 = vsel %vm497_vm2, %v500_v41, %v503_v45  ;;  %v395_v34 = vsel %vm388_vm5, %v391_v36, %v394_v21  ;;  %vm833_vm2 = vweird.f32 %v1471_v20  ;;  %vm510_vm5 = vcmask 519552  }
 0x124   :  { %v505_v42 = vsel %vm385_vm12, nan, %v504_v28  ;;  %v396_v49 = vsel %vm385_vm12, nan, %v395_v34  ;;  %vm840_vm12 = vcmp.eq.s32.totalorder %v1766_v15, 2  ;;  %v953_v9 = vsel %vm833_vm2, nan, %v952_v32 }
 0x125   :  { %507 = vrot.lane.b32.xlu1 %v505_v42, %s1407_s9  ;;  %398 = vrot.lane.b32.xlu0 %v396_v49, %s1408_s10  ;;  %v842_v2 = vsel %vm840_vm12, %v841_v38, %v1298_v14 }
 0x126   :  { %v843_v48 = vsel %vm836_vm1, %v839_v46, %v842_v2 }
 0x127   :  { %v844_v29 = vsel %vm833_vm2, nan, %v843_v48 }
 0x129   :  { %731 = vrot.lane.b32.xlu1 %v729_v11, %s1409_s11  ;;  %622 = vrot.lane.b32.xlu0 %v620_v59, %s1410_s12 }
 0x12d   :  { %955 = vrot.lane.b32.xlu1 %v953_v9, %s1411_s13  ;;  %846 = vrot.lane.b32.xlu0 %v844_v29, %s1412_s14 }
 0x175   :  { %v284_v50 = vpop.permute.xlu1 %283 }
 0x176   :  { %287 = vst.msk [vmem:[#allocation2] sm:$0xf] %vm286_vm3, %v284_v50 }
 0x197   :  { %v508_v52 = vpop.permute.xlu1 %507  ;;  %v399_v43 = vpop.permute.xlu0 %398 }
 0x198   :  { %402 = vst.msk [vmem:[#allocation2] sm:$0xf] %vm401_vm4, %v399_v43 }
 0x199   :  { %511 = vst.msk [vmem:[#allocation2] sm:$0xf] %vm510_vm5, %v508_v52 }
 0x19b   :  { %v732_v20 = vpop.permute.xlu1 %731  ;;  %v623_v47 = vpop.permute.xlu0 %622 }
 0x19c   :  { %626 = vst.msk [vmem:[#allocation2] sm:$0xf] %vm625_vm6, %v623_v47 }
 0x19d   :  { %735 = vst.msk [vmem:[#allocation2] sm:$0xf] %vm734_vm7, %v732_v20 }
 0x19f   :  { %v956_v54 = vpop.permute.xlu1 %955  ;;  %v847_v55 = vpop.permute.xlu0 %846 }
 0x1a0   :  { %850 = vst.msk [vmem:[#allocation2] sm:$0xf] %vm849_vm8, %v847_v55 }
 0x1a1   :  { %959 = vst.msk [vmem:[#allocation2] sm:$0xf] %vm958_vm9, %v956_v54 }
 0x1a8   :  { %v1042_v22 = vld [vmem:[#allocation2] sm:$0xf] }
 0x1a9   :  { %1239 = vmatmul.mubr.f32.vlgmr.msra.gmra.mxu1 %v1042_v22 }
 0x1d2   :  { %v1038_v56 = vpop.f32.mrf.mxu0 }
 0x1d3   :  { %v1039_v4 = vadd.f32 %v1180_v57, %v1038_v56 }
 0x1d4   :  { %v1205_v17 = vpop.f32.mrf.mxu0 }
 0x269   :  { %v1125_v39 = vpop.f32.mrf.mxu1 }
 0x26a   :  { %v1129_v40 = vadd.f32 %v1125_v39, %v1039_v4 }
 0x26b   :  { %v1240_v58 = vpop.f32.mrf.mxu1 }
 0x26c   :  { %1130 = vst [vmem:[#allocation9] sm:$0xf] %v1129_v40 }
 0x26d   :  { %1374 = shalt.err (!%p1371_p5)
}
 0x26e   :  { %1140 = dma.vmem_to_hbm [thread:$0]  %s1138_s18, 64, %s1825_s5, [#allocation5]  }
 0x26f   :  { %1387 = dma.done.wait [#allocation5], 64  }
 0x270   :  { %1388 = vsyncadd [#allocation5], 4294967232 }
 0x271   :  { %1144 = vsyncpa [#allocation4], 1 }
 0x272   :  { %1145 = vsyncpa [#allocation7], 1 }
 0x273   :  { %1146 = vsyncpa [#allocation5], 1 }

</bundles_post_ra>
